<compile_context>
chip_gen: v5e
topology: v5e:2x2
jax: 0.10.0
libtpu: 0.0.40
codegen_flags: <defaults>
</compile_context>

<pallas_src>
import jax
import jax.numpy as jnp
from jax.experimental import pallas as pl
from jax.experimental.pallas import tpu as pltpu


def _chomp_copy_kernel(x_ref, o_ref):
    # Both refs are (TR, TL) tiles of the flattened (rows, L_out) view.
    # Pallas clamps partial input blocks and masks partial output writebacks, so a
    # full-block copy is correct even on the ragged boundary tiles.
    o_ref[...] = x_ref[...]


def _round_up(x: int, m: int) -> int:
    return pl.cdiv(x, m) * m


def _vmem_budgets():
    """Generation-aware (tile_footprint_budget, vmem_limit) in bytes."""
    try:
        cap = int(getattr(pltpu.get_tpu_info(), "vmem_capacity_bytes", 64 * 1024 * 1024))
    except Exception:
        cap = 64 * 1024 * 1024  # conservative: v7x per-TC VMEM
    # footprint = in + out, double-buffered = 4 * TR * TL * itemsize
    tile_budget = min(24 * 1024 * 1024, cap // 4)   # 24 MiB on v5e/v6e, 16 MiB on v7x
    vmem_limit = min(cap // 2, 2 * tile_budget)     # 48 MiB on v5e/v6e, 32 MiB on v7x
    return tile_budget, vmem_limit


def chomp1d(x: jax.Array, chomp_size: int, *, force_pallas: bool = False) -> jax.Array:
    """Pallas equivalent of PyTorch Chomp1d: x[:, :, :-chomp_size].contiguous().

    Note: chomp_size must be > 0 (PyTorch's `:-0` would yield an empty tensor; we keep
    the stricter, documented assert).
    """
    assert chomp_size > 0, "chomp_size must be positive"
    N, C, L = x.shape
    L_out = L - chomp_size
    assert L_out > 0, "chomp_size must be smaller than the time dimension"

    R = N * C
    itemsize = jnp.dtype(x.dtype).itemsize

    # Small-input fast path: pallas_call launch cost dwarfs a sub-MiB copy.
    if not force_pallas and R * L_out * itemsize < (1 << 20):
        return x[:, :, :L_out]

    # Flatten batch+channel into one row axis; time stays the lane axis.
    x2 = x.reshape(R, L)

    # sublane packing: 8 rows per vreg for 32-bit, 16 for 16-bit, 32 for 8-bit.
    sublane = {4: 8, 2: 16, 1: 32}.get(itemsize, 8)
    R_pad = _round_up(R, sublane)
    L_pad = _round_up(L_out, 128)

    tile_budget, vmem_limit = _vmem_budgets()
    # Elements per tile allowed by the double-buffered (in + out) footprint.
    budget_elems = max(tile_budget // (4 * itemsize), sublane * 128)

    if L_pad * sublane <= budget_elems:
        # Preferred shape: columns span all of L_out -> contiguous output slabs,
        # grid is effectively 1-D over rows.
        TL = L_pad
        TR = min(R_pad, max(sublane, (budget_elems // TL) // sublane * sublane))
    else:
        # L_out too wide for even a single sublane strip at full width: tile columns.
        TR = sublane
        TL = min(L_pad, max(128, (budget_elems // sublane) // 128 * 128))

    # Feed both v7x TensorCores: the (parallel) row axis carries the parallelism, so
    # make sure it has at least 2 grid steps whenever there is enough data.
    if pl.cdiv(R_pad, TR) == 1 and R_pad > sublane:
        TR = _round_up(pl.cdiv(R_pad, 2), sublane)

    grid = (pl.cdiv(R, TR), pl.cdiv(L_out, TL))

    out2 = pl.pallas_call(
        _chomp_copy_kernel,
        out_shape=jax.ShapeDtypeStruct((R, L_out), x.dtype),
        grid_spec=pltpu.PrefetchScalarGridSpec(
            num_scalar_prefetch=0,
            grid=grid,
            # Input blocks are indexed over the *output* column range, so the chomped
            # tail is only touched (partially, clamped by Pallas) by the boundary tile.
            in_specs=[pl.BlockSpec((TR, TL), lambda r, l: (r, l))],
            out_specs=pl.BlockSpec((TR, TL), lambda r, l: (r, l)),
        ),
        compiler_params=pltpu.CompilerParams(
            # Both axes are independent -> shardable across v7x's 2 TensorCores.
            dimension_semantics=("parallel", "parallel"),
            vmem_limit_bytes=vmem_limit,
        ),
    )(x2)

    return out2.reshape(N, C, L_out)


if __name__ == "__main__":
    key = jax.random.PRNGKey(0)

    # 1) Primary small test (matches the module's typical NCL usage); force the Pallas
    #    path so the kernel itself is exercised on small shapes.
    N, C, L = 2, 4, 16
    chomp_size = 3
    x = jax.random.normal(key, (N, C, L), dtype=jnp.float32)
    out = jax.block_until_ready(chomp1d(x, chomp_size, force_pallas=True))
    ref = x[:, :, :-chomp_size]
    assert out.shape == (N, C, L - chomp_size), out.shape
    assert jnp.array_equal(out, ref), "mismatch vs reference slice (small, Pallas path)"

    # 2) Same shape through the default small-input fast path (plain XLA slice).
    out_fast = jax.block_until_ready(chomp1d(x, chomp_size))
    assert jnp.array_equal(out_fast, ref), "mismatch vs reference slice (fast path)"

    # 3) Larger test: full-width column tile, multi-step row grid, lane-dense stores.
    key2 = jax.random.PRNGKey(1)
    N2, C2, L2, chomp2 = 4, 64, 2061, 13  # L_out = 2048 -> TL spans all columns
    x2 = jax.random.normal(key2, (N2, C2, L2), dtype=jnp.float32)
    out2 = jax.block_until_ready(chomp1d(x2, chomp2))
    ref2 = x2[:, :, :-chomp2]
    assert out2.shape == ref2.shape, out2.shape
    assert jnp.array_equal(out2, ref2), "mismatch vs reference slice (large tiled case)"

    # 4) bf16 test: exercises dtype-aware sublane rounding (16 rows/vreg).
    key3 = jax.random.PRNGKey(2)
    N3, C3, L3, chomp3 = 2, 16, 200, 8
    x3 = jax.random.normal(key3, (N3, C3, L3), dtype=jnp.float32).astype(jnp.bfloat16)
    out3 = jax.block_until_ready(chomp1d(x3, chomp3, force_pallas=True))
    ref3 = x3[:, :, :-chomp3]
    assert out3.shape == ref3.shape, out3.shape
    assert jnp.array_equal(out3, ref3), "mismatch vs reference slice (bf16 case)"

    print("KERNEL_OK")
</pallas_src>

<mosaic_0001>
module attributes {stable_mosaic.version = 11 : i64} {
  func.func @_chomp_copy_kernel(%arg0: i32, %arg1: i32, %arg2: memref<8x128xf32, #tpu.memory_space<vmem>>, %arg3: memref<8x128xf32, #tpu.memory_space<vmem>>) attributes {dimension_semantics = [#tpu.dimension_semantics<parallel>, #tpu.dimension_semantics<parallel>], iteration_bounds = array<i64: 1, 1>, scalar_prefetch = 0 : i64, scratch_operands = 0 : i64, tpu.core_type = #tpu.core_type<tc>, window_params = [{transform_indices = @transform_0, window_bounds = array<i64: 8, 128>}, {transform_indices = @transform_1, window_bounds = array<i64: 8, 128>}]} {
    %c0 = arith.constant 0 : index
    %c0_0 = arith.constant 0 : index
    %0 = vector.load %arg2[%c0, %c0_0] : memref<8x128xf32, #tpu.memory_space<vmem>>, vector<8x128xf32>
    %c0_1 = arith.constant 0 : index
    %c0_2 = arith.constant 0 : index
    %1 = vector.load %arg3[%c0_1, %c0_2] : memref<8x128xf32, #tpu.memory_space<vmem>>, vector<8x128xf32>
    tpu.vector_store %arg3[%c0_1, %c0_2], %0 {strides = array<i32>} : memref<8x128xf32, #tpu.memory_space<vmem>>, vector<8x128xf32>,
    return
  }
  func.func @transform_0(%arg0: i32, %arg1: i32) -> (i32, i32) {
    %c0_i32 = arith.constant 0 : i32
    return %arg0, %arg1 : i32, i32
  }
  func.func @transform_1(%arg0: i32, %arg1: i32) -> (i32, i32) {
    %c0_i32 = arith.constant 0 : i32
    return %arg0, %arg1 : i32, i32
  }
}

</mosaic_0001>

<bundles_post_ra>
// kernel: tpu_custom_call.1
= control target key start
LH: loop header
LB: loop body
LE: loop exit
PB: predicated region body
PF: predicated region fallthrough
CT: control target
= control target key end

     0   :  { %6 = vsyncpa [#allocation3], 0  ;;  %s114_s0 = inlined_call_operand.hbm [shape: f32[8,16], index: 0, kind: input, shape index: {}]   ;;  %s115_s1 = inlined_call_operand.hbm [shape: f32[8,13], index: 1, kind: output, shape index: {}]  }
   0x1   :  { %7 = vsyncpa [#allocation4], 0  ;;  %s13_s8 = sshll.u32 %s114_s0, 4  ;;  %s96_s9 = smov [#allocation2]   ;;  %s14_s8 = int_to_ptr.hbm [resolvable:$true] %s13_s8 }
   0x2   :  { %s15_s10 = sshll.u32 %s96_s9, 4  ;;  %s16_s10 = int_to_ptr.vmem [resolvable:$true] %s15_s10 }
   0x3   :  { %18 = dma.hbm_to_vmem [thread:$0]  %s14_s8, 128, %s16_s10, [#allocation3]  }
   0x4   :  { %92 = dma.done.wait [#allocation3], 128  }
   0x5   :  { %93 = vsyncadd [#allocation3], 4294967168  ;;  %s97_s11 = smov [#allocation5]   ;;  %s32_s15 = sshll.u32 %s115_s1, 4  ;;  %v23_v0 = vld [vmem:[#allocation2] sm:$0xff]  ;;  %s33_s15 = int_to_ptr.hbm [resolvable:$true] %s32_s15 }
   0x6   :  { %s30_s12 = sshll.u32 %s97_s11, 4  ;;  %24 = vst [vmem:[#allocation5] sm:$0xff] %v23_v0  ;;  %s31_s12 = int_to_ptr.vmem [resolvable:$true] %s30_s12 }
   0x7   :  { %35 = dma.vmem_to_hbm [thread:$0]  %s31_s12, 128, %s33_s15, [#allocation4]  }
   0x8   :  { %94 = dma.done.wait [#allocation4], 128  }
   0x9   :  { %95 = vsyncadd [#allocation4], 4294967168 }
   0xa   :  { %40 = vsyncpa [#allocation3], 1 }
   0xb   :  { %41 = vsyncpa [#allocation4], 1 }

</bundles_post_ra>
